<compile_context>
chip_gen: v7x
topology: tpu7x:2x2x1
jax: 0.10.0
libtpu: 0.0.40
codegen_flags: <defaults>
</compile_context>

<pallas_src>
import functools
import math

import jax
import jax.numpy as jnp
from jax.experimental import pallas as pl
from jax.experimental.pallas import tpu as pltpu


_TWO_PASS_BLOCK_BUDGET = 4 * 1024 * 1024   # ~4 MiB per buffer in the fallback passes


# ---------------------------------------------------------------------------
# Small helpers
# ---------------------------------------------------------------------------

def _vmem_capacity_bytes():
    """Physical VMEM of the local TPU (64 MiB on v7x, 128 MiB on v5e/v6e)."""
    try:
        return int(pltpu.get_tpu_info().vmem_capacity_bytes)
    except Exception:
        return 64 * 1024 * 1024            # conservative default (v7x)


def _vmem_limit_bytes(per_step_bytes, capacity):
    """Request what the chosen blocks need (x2 double-buffering) plus margin,
    clipped below the physical capacity instead of asking for all of it."""
    need = 2 * per_step_bytes + (8 << 20)
    need = max(need, 32 << 20)
    return int(min(need, capacity - (8 << 20)))


def _pick_tile(n, align, cap):
    """Largest multiple of `align` dividing n and <= cap; falls back to n (the
    full dimension is always a legal block) when n is not align-divisible."""
    if n % align != 0:
        return n
    cap = max(cap - cap % align, align)
    best = align
    for t in range(align, min(n, cap) + 1, align):
        if n % t == 0:
            best = t
    return best


def _spatial_sums_f32(x):
    """Per-channel f32 sums over the trailing spatial axis of a (1, C, HW) tile.

    Accumulates 128-lane groups with VPU adds (sub-f32 inputs are cast per
    group, so no full-size f32 temp) and does one cross-lane reduce at the end.
    """
    hw = x.shape[-1]
    ngrp = hw // 128
    if hw % 128 == 0 and 2 <= ngrp <= 256:
        acc = x[:, :, 0:128].astype(jnp.float32)
        for g in range(1, ngrp):
            acc = acc + x[:, :, g * 128:(g + 1) * 128].astype(jnp.float32)
        return jnp.sum(acc, axis=-1)                        # (1, C)
    return jnp.sum(x.astype(jnp.float32), axis=-1)          # (1, C)


def _shift_channels(m, off):
    """tap[:, c] = m[:, c + off] with zero fill at the edges; m is (1, C) f32."""
    c = m.shape[-1]
    z = jnp.zeros((1, abs(off)), jnp.float32)
    if off > 0:
        return jnp.concatenate([m[:, off:], z], axis=-1)
    return jnp.concatenate([z, m[:, :c + off]], axis=-1)


# ---------------------------------------------------------------------------
# Fused single-pass kernel (primary path): pool + conv + sigmoid + scale
# ---------------------------------------------------------------------------

def _eca_fused_kernel(k, pad, w_ref, x_ref, o_ref):
    """w_ref: (k,) f32 in SMEM, pre-scaled by 1/(H*W).
       x_ref / o_ref: (1, C, HW) native-dtype slab of one batch element."""
    x = x_ref[...]                                           # (1, C, HW)
    c = x.shape[1]
    m = _spatial_sums_f32(x)                                 # (1, C) f32 channel sums

    # k-tap channel conv as scalar-weighted shifted copies (VPU/XLU only).
    y = w_ref[pad] * m
    for t in range(k):
        off = t - pad
        if off == 0 or abs(off) >= c:
            continue
        y = y + w_ref[t] * _shift_channels(m, off)

    gate = jax.nn.sigmoid(y).astype(o_ref.dtype)             # (1, C)
    o_ref[...] = x * gate[:, :, None]                        # broadcast over HW


def _eca_fused(x3, conv_weight, k, pad, capacity):
    b, c, hw = x3.shape
    itemsize = x3.dtype.itemsize
    # Fold the 1/(H*W) mean normalization into the conv weights (SMEM).
    w_scaled = conv_weight.astype(jnp.float32) * (1.0 / hw)

    slab = c * hw * itemsize
    f32_temp = c * hw * 4 if itemsize < 4 else 0
    limit = _vmem_limit_bytes(2 * slab + f32_temp, capacity)

    return pl.pallas_call(
        functools.partial(_eca_fused_kernel, k, pad),
        out_shape=jax.ShapeDtypeStruct((b, c, hw), x3.dtype),
        grid_spec=pltpu.PrefetchScalarGridSpec(
            num_scalar_prefetch=0,
            grid=(b,),
            in_specs=[
                pl.BlockSpec(memory_space=pltpu.MemorySpace.SMEM),   # (k,) weights
                pl.BlockSpec((1, c, hw), lambda i: (i, 0, 0)),       # x slab
            ],
            out_specs=pl.BlockSpec((1, c, hw), lambda i: (i, 0, 0)),
        ),
        compiler_params=pltpu.CompilerParams(
            dimension_semantics=("parallel",),
            vmem_limit_bytes=limit,
        ),
    )(w_scaled, x3)


# ---------------------------------------------------------------------------
# Two-pass fallback (per-batch slab does not fit VMEM)
# ---------------------------------------------------------------------------

def _pool_partial_kernel(x_ref, part_ref):
    """Lane-dense pooling: accumulate (1, c_tile, 128) f32 partial sums with pure
    VPU adds; the final 128-lane reduce happens in the wrapper glue."""
    t = pl.program_id(2)

    @pl.when(t == 0)
    def _():
        part_ref[...] = jnp.zeros_like(part_ref)

    x = x_ref[...]                                           # (1, c_tile, hw_tile)
    acc = part_ref[...]
    for g in range(x.shape[-1] // 128):
        acc = acc + x[:, :, g * 128:(g + 1) * 128].astype(jnp.float32)
    part_ref[...] = acc


def _pool_reduce_kernel(x_ref, sums_ref):
    """Pooling fallback for HW not divisible by 128: per-tile cross-lane reduce
    into a (1, c_tile, 1) resident accumulator (C stays on sublanes)."""
    t = pl.program_id(2)

    @pl.when(t == 0)
    def _():
        sums_ref[...] = jnp.zeros_like(sums_ref)

    sums_ref[...] += jnp.sum(x_ref[...].astype(jnp.float32), axis=-1, keepdims=True)


def _scale_kernel(g_ref, x_ref, o_ref):
    """Pure broadcast multiply; the gate arrives precomputed as (1, c_tile, 1)."""
    o_ref[...] = x_ref[...] * g_ref[...]


def _eca_two_pass(x3, conv_weight, k, pad, capacity):
    b, c, hw = x3.shape
    itemsize = x3.dtype.itemsize

    c_tile = _pick_tile(c, 8, 256)
    hw_tile = _pick_tile(hw, 128,
                         max(_TWO_PASS_BLOCK_BUDGET // (c_tile * itemsize), 128))
    grid = (b, c // c_tile, hw // hw_tile)

    # -------- pass 1: per-channel f32 sums (reads x once) ---------------------
    if hw % 128 == 0:
        pool_limit = _vmem_limit_bytes(
            c_tile * hw_tile * itemsize + c_tile * 128 * 4, capacity)
        partials = pl.pallas_call(
            _pool_partial_kernel,
            out_shape=jax.ShapeDtypeStruct((b, c, 128), jnp.float32),
            grid_spec=pltpu.PrefetchScalarGridSpec(
                num_scalar_prefetch=0,
                grid=grid,
                in_specs=[pl.BlockSpec((1, c_tile, hw_tile),
                                       lambda i, j, t: (i, j, t))],
                out_specs=pl.BlockSpec((1, c_tile, 128),
                                       lambda i, j, t: (i, j, 0)),
            ),
            compiler_params=pltpu.CompilerParams(
                dimension_semantics=("parallel", "parallel", "arbitrary"),
                vmem_limit_bytes=pool_limit,
            ),
        )(x3)
        sums = jnp.sum(partials, axis=-1)                    # (B, C) f32
    else:
        pool_limit = _vmem_limit_bytes(
            c_tile * hw_tile * itemsize + c_tile * 4, capacity)
        sums3 = pl.pallas_call(
            _pool_reduce_kernel,
            out_shape=jax.ShapeDtypeStruct((b, c, 1), jnp.float32),
            grid_spec=pltpu.PrefetchScalarGridSpec(
                num_scalar_prefetch=0,
                grid=grid,
                in_specs=[pl.BlockSpec((1, c_tile, hw_tile),
                                       lambda i, j, t: (i, j, t))],
                out_specs=pl.BlockSpec((1, c_tile, 1),
                                       lambda i, j, t: (i, j, 0)),
            ),
            compiler_params=pltpu.CompilerParams(
                dimension_semantics=("parallel", "parallel", "arbitrary"),
                vmem_limit_bytes=pool_limit,
            ),
        )(x3)
        sums = sums3[:, :, 0]                                # (B, C) f32

    # -------- tiny glue: gate = sigmoid(conv(mean)), O(B*k*C) -----------------
    mean = sums * (1.0 / hw)                                 # (B, C) f32
    mean_p = jnp.pad(mean, ((0, 0), (pad, pad)))             # (B, C + 2*pad)
    y = jnp.zeros_like(mean)
    for t in range(k):
        y = y + conv_weight[t].astype(jnp.float32) * mean_p[:, t:t + c]
    gate = jax.nn.sigmoid(y).astype(x3.dtype)[:, :, None]    # (B, C, 1) native dtype

    # -------- pass 2: pure broadcast scale (reads x once more) ----------------
    scale_limit = _vmem_limit_bytes(
        2 * c_tile * hw_tile * itemsize + c_tile * itemsize, capacity)
    # TODO(synk): optionally add input_output_aliases={1: 0} when the caller
    # donates x (saves an HBM allocation; does not change HBM bandwidth).
    return pl.pallas_call(
        _scale_kernel,
        out_shape=jax.ShapeDtypeStruct((b, c, hw), x3.dtype),
        grid_spec=pltpu.PrefetchScalarGridSpec(
            num_scalar_prefetch=0,
            grid=grid,
            in_specs=[
                pl.BlockSpec((1, c_tile, 1), lambda i, j, t: (i, j, 0)),        # gate
                pl.BlockSpec((1, c_tile, hw_tile), lambda i, j, t: (i, j, t)),  # x
            ],
            out_specs=pl.BlockSpec((1, c_tile, hw_tile), lambda i, j, t: (i, j, t)),
        ),
        compiler_params=pltpu.CompilerParams(
            dimension_semantics=("parallel", "parallel", "parallel"),
            vmem_limit_bytes=scale_limit,
        ),
    )(gate, x3)


# ---------------------------------------------------------------------------
# Public wrapper
# ---------------------------------------------------------------------------

def eca_layer(x, conv_weight, *, force_two_pass=False):
    """x: (B, C, H, W) float (f32/bf16/...).  conv_weight: (k,) from
    Conv1d(1, 1, k, bias=False).  Matches ECA_Layer.forward."""
    b, c, h, w = x.shape
    k = int(conv_weight.shape[0])
    assert k % 2 == 1, "ECA kernel size must be odd"
    pad = (k - 1) // 2
    hw = h * w
    itemsize = x.dtype.itemsize

    x3 = x.reshape(b, c, hw)                       # native dtype end-to-end
    capacity = _vmem_capacity_bytes()

    # Fused single-pass if one batch element's (C, HW) slab (double-buffered,
    # in+out, plus a possible f32 upcast temp) fits comfortably in VMEM.
    slab = c * hw * itemsize
    f32_temp = c * hw * 4 if itemsize < 4 else 0
    fused_need = 4 * slab + f32_temp + (4 << 20)
    if (not force_two_pass) and fused_need <= capacity // 2:
        out3 = _eca_fused(x3, conv_weight, k, pad, capacity)
    else:
        out3 = _eca_two_pass(x3, conv_weight, k, pad, capacity)
    return out3.reshape(b, c, h, w)


# ---------------------------------------------------------------------------
# Plain-JAX reference (matches the PyTorch module)
# ---------------------------------------------------------------------------

def eca_reference(x, conv_weight):
    b, c, h, w = x.shape
    k = conv_weight.shape[0]
    pad = (k - 1) // 2
    mean = jnp.mean(x.astype(jnp.float32), axis=(2, 3))            # (B, C)
    mean_p = jnp.pad(mean, ((0, 0), (pad, pad)))                   # (B, C + 2*pad)
    y = jnp.zeros((b, c), jnp.float32)
    for t in range(k):
        y = y + conv_weight[t] * mean_p[:, t:t + c]
    s = jax.nn.sigmoid(y)
    return x.astype(jnp.float32) * s[:, :, None, None]


if __name__ == "__main__":
    root = jax.random.PRNGKey(0)
    kx, kw, kx2, kx3 = jax.random.split(root, 4)

    B, C, H, W = 2, 4, 16, 16
    KERNEL = 3

    x = jax.random.normal(kx, (B, C, H, W), dtype=jnp.float32)
    # Conv1d(1, 1, 3, bias=False) weight init mimicking torch's 1/sqrt(fan_in) bound.
    bound = 1.0 / math.sqrt(KERNEL)
    conv_w = jax.random.uniform(kw, (KERNEL,), minval=-bound, maxval=bound,
                                dtype=jnp.float32)

    eca = jax.jit(eca_layer, static_argnames=("force_two_pass",))

    # 1) fused single-pass path, f32.
    out = jax.block_until_ready(eca(x, conv_w))
    ref = eca_reference(x, conv_w)
    assert out.shape == (B, C, H, W) and out.dtype == x.dtype
    assert jnp.allclose(out, ref, atol=1e-5, rtol=1e-5), "fused f32 mismatch"

    # 2) fused path, native bf16 (no forced f32 round-trip of x).
    x_bf16 = x.astype(jnp.bfloat16)
    out_bf16 = jax.block_until_ready(eca(x_bf16, conv_w))
    assert out_bf16.dtype == jnp.bfloat16
    assert jnp.allclose(out_bf16.astype(jnp.float32), ref, atol=6e-2, rtol=6e-2), \
        "fused bf16 mismatch"

    # 3) two-pass fallback, lane-dense pooling path (HW % 128 == 0).
    x2 = jax.random.normal(kx2, (2, 16, 16, 16), dtype=jnp.float32)
    out2 = jax.block_until_ready(eca(x2, conv_w, force_two_pass=True))
    assert jnp.allclose(out2, eca_reference(x2, conv_w), atol=1e-5, rtol=1e-5), \
        "two-pass (lane-dense pool) mismatch"

    # 4) two-pass fallback, ragged-HW pooling path (HW % 128 != 0).
    x3_ = jax.random.normal(kx3, (2, 16, 12, 12), dtype=jnp.float32)
    out3_ = jax.block_until_ready(eca(x3_, conv_w, force_two_pass=True))
    assert jnp.allclose(out3_, eca_reference(x3_, conv_w), atol=1e-5, rtol=1e-5), \
        "two-pass (ragged HW) mismatch"

    print("KERNEL_OK")
</pallas_src>

<mosaic_0001>
module attributes {stable_mosaic.version = 11 : i64} {
  func.func @_eca_fused_kernel(%arg0: i32, %arg1: memref<3xf32, #tpu.memory_space<smem>>, %arg2: memref<1x4x256xf32, #tpu.memory_space<vmem>>, %arg3: memref<1x4x256xf32, #tpu.memory_space<vmem>>) attributes {dimension_semantics = [#tpu.dimension_semantics<parallel>], iteration_bounds = array<i64: 2>, scalar_prefetch = 0 : i64, scratch_operands = 0 : i64, tpu.core_type = #tpu.core_type<tc>, window_params = [{transform_indices = @transform_0, window_bounds = array<i64: 3>}, {transform_indices = @transform_1, window_bounds = array<i64: 1, 4, 256>}, {transform_indices = @transform_2, window_bounds = array<i64: 1, 4, 256>}]} {
    %c0 = arith.constant 0 : index
    %c0_0 = arith.constant 0 : index
    %c0_1 = arith.constant 0 : index
    %0 = vector.load %arg2[%c0, %c0_0, %c0_1] : memref<1x4x256xf32, #tpu.memory_space<vmem>>, vector<1x4x256xf32>
    %1 = vector.extract_strided_slice %0 {offsets = [0, 0, 0], sizes = [1, 4, 128], strides = [1, 1, 1]} : vector<1x4x256xf32> to vector<1x4x128xf32>
    %2 = vector.extract_strided_slice %0 {offsets = [0, 0, 128], sizes = [1, 4, 128], strides = [1, 1, 1]} : vector<1x4x256xf32> to vector<1x4x128xf32>
    %3 = arith.addf %1, %2 : vector<1x4x128xf32>
    %cst = arith.constant dense<0.000000e+00> : vector<1x4xf32>
    %4 = vector.multi_reduction <add>, %3, %cst [2] : vector<1x4x128xf32> to vector<1x4xf32>
    %c1 = arith.constant 1 : index
    %5 = memref.load %arg1[%c1] : memref<3xf32, #tpu.memory_space<smem>>
    %6 = vector.broadcast %5 : f32 to vector<1x4xf32>
    %7 = arith.mulf %6, %4 : vector<1x4xf32>
    %c0_2 = arith.constant 0 : index
    %8 = memref.load %arg1[%c0_2] : memref<3xf32, #tpu.memory_space<smem>>
    %cst_3 = arith.constant 0.000000e+00 : f32
    %9 = vector.broadcast %cst_3 : f32 to vector<1x1xf32>
    %10 = vector.extract_strided_slice %4 {offsets = [0, 0], sizes = [1, 3], strides = [1, 1]} : vector<1x4xf32> to vector<1x3xf32>
    %11 = tpu.concatenate %9, %10 in 1 : vector<1x1xf32>, vector<1x3xf32> -> vector<1x4xf32>
    %12 = vector.broadcast %8 : f32 to vector<1x4xf32>
    %13 = arith.mulf %12, %11 : vector<1x4xf32>
    %14 = arith.addf %7, %13 : vector<1x4xf32>
    %c2 = arith.constant 2 : index
    %15 = memref.load %arg1[%c2] : memref<3xf32, #tpu.memory_space<smem>>
    %cst_4 = arith.constant 0.000000e+00 : f32
    %16 = vector.broadcast %cst_4 : f32 to vector<1x1xf32>
    %17 = vector.extract_strided_slice %4 {offsets = [0, 1], sizes = [1, 3], strides = [1, 1]} : vector<1x4xf32> to vector<1x3xf32>
    %18 = tpu.concatenate %17, %16 in 1 : vector<1x3xf32>, vector<1x1xf32> -> vector<1x4xf32>
    %19 = vector.broadcast %15 : f32 to vector<1x4xf32>
    %20 = arith.mulf %19, %18 : vector<1x4xf32>
    %21 = arith.addf %14, %20 : vector<1x4xf32>
    %22 = arith.negf %21 : vector<1x4xf32>
    %23 = math.exp %22 : vector<1x4xf32>
    %cst_5 = arith.constant 1.000000e+00 : f32
    %24 = vector.broadcast %cst_5 : f32 to vector<1x4xf32>
    %25 = arith.addf %24, %23 : vector<1x4xf32>
    %26 = arith.divf %24, %25 : vector<1x4xf32>
    %27 = vector.shape_cast %26 : vector<1x4xf32> to vector<1x4x1xf32>
    %28 = vector.broadcast %27 : vector<1x4x1xf32> to vector<1x4x256xf32>
    %29 = arith.mulf %0, %28 : vector<1x4x256xf32>
    %c0_6 = arith.constant 0 : index
    %c0_7 = arith.constant 0 : index
    %c0_8 = arith.constant 0 : index
    %30 = vector.load %arg3[%c0_6, %c0_7, %c0_8] : memref<1x4x256xf32, #tpu.memory_space<vmem>>, vector<1x4x256xf32>
    tpu.vector_store %arg3[%c0_6, %c0_7, %c0_8], %29 {strides = array<i32>} : memref<1x4x256xf32, #tpu.memory_space<vmem>>, vector<1x4x256xf32>,
    return
  }
  func.func @transform_0(%arg0: i32) -> i32 {
    %c0_i32 = arith.constant 0 : i32
    %c0_i32_0 = arith.constant 0 : i32
    return %c0_i32 : i32
  }
  func.func @transform_1(%arg0: i32) -> (i32, i32, i32) {
    %c0_i32 = arith.constant 0 : i32
    %c0_i32_0 = arith.constant 0 : i32
    %c0_i32_1 = arith.constant 0 : i32
    return %arg0, %c0_i32, %c0_i32_0 : i32, i32, i32
  }
  func.func @transform_2(%arg0: i32) -> (i32, i32, i32) {
    %c0_i32 = arith.constant 0 : i32
    %c0_i32_0 = arith.constant 0 : i32
    %c0_i32_1 = arith.constant 0 : i32
    return %arg0, %c0_i32, %c0_i32_0 : i32, i32, i32
  }
}

</mosaic_0001>

<bundles_post_ra>
// kernel: eca_layer.1
= control target key start
LH: loop header
LB: loop body
LE: loop exit
PB: predicated region body
PF: predicated region fallthrough
CT: control target
= control target key end

     0   :  { %7 = vsyncpa [#allocation3], 0  ;;  %s392_s9 = smov 0   ;;  %s430_s0 = inlined_call_operand.vmem [shape: f32[3], index: 0, kind: input, shape index: {}]   ;;  %s431_s1 = inlined_call_operand.vmem [shape: f32[2,4,256], index: 1, kind: input, shape index: {}]   ;;  %s432_s2 = inlined_call_operand.vmem [shape: f32[2,4,256], index: 2, kind: output, shape index: {}]  }
   0x1 LB: > { %s302_s10 = sadd.s32 4294967295, %s372_s9   ;;  %p304_p0 = scmp.ge.s32.totalorder %s372_s9, 1  ;;  %s372_s9 = sphi %s392_s9, %s13_s9  }
   0x2   : > { %p91_p1 = scmp.lt.s32.totalorder %s372_s9, 3  ;;  %s104_s13 = sshll.u32 %s430_s0, 4  ;;  %s105_s13 = int_to_ptr.vmem [resolvable:$true] %s104_s13 }
   0x3   : > { %p328_p3 = scmp.eq.s32.totalorder %s302_s10, 0  ;;  %s347_s15 = scalar_lea.vmem %s105_s13, 16 }
   0x4   : > { %p403_p2 = pnand %p304_p0, %p91_p1  ;;  %p348_p6 = scmp.ne.s32.totalorder %s105_s13, %s347_s15 }
   0x5   : > { %p355_p10 = scmp.lt.s32.totalorder %s105_s13, %s105_s13  ;;  %p356_p11 = scmp.lt.s32.totalorder %s347_s15, %s347_s15 }
   0x6   : > { %p324_p4 = pneg %p403_p2 }
   0x7   : > { %p357_p12 = por %p356_p11, %p355_p10 }
   0x8   : > { %p325_p5 = pnand %p328_p3, %p324_p4 }
   0xa   : > { %p349_p7 = pneg %p325_p5 }
   0xc   : > { %p350_p8 = pnand %p349_p7, %p348_p6 }
   0xe   : > { %p351_p9 = pneg %p350_p8 }
  0x10   : > { %p358_p13 = pnand %p357_p12, %p351_p9 }
  0x12   : > { %361 = shalt.err (!%p358_p13)
}
  0x13   : > { %s374_s16 = smov [#allocation2]   ;;  %125 = sbr.rel (%p403_p2) target bundleno = 467 (0x1d3), region = 28 }
  0x14   : > { %327 = dma.vmem_to_smem (!%p325_p5), %s105_s13, 16, %s374_s16, [#allocation3]  }
  0x1a   : > { %367 = dma.done.wait (%p328_p3), [#allocation3], 16  }
  0x1b   : > { %369 = vsyncadd (%p328_p3), [#allocation3], 4294967280 }
  0x1c   : > { %131 = sfence }
  0x1d   : > { %p148_p0 = scmp.lt.s32.totalorder %s302_s10, 1  ;;  %vm163_vm0 = vcmask 1043456   ;;  %v172_v4 = vlaneseq  ;;  %s314_s21 = sld [smem:[#allocation2 + $0x2]]  ;;  %vm201_vm1 = vcmask 23552   ;;  %vm180_vm2 = vcmask 7168  }
  0x1e   : > { %s170_s22 = sld [smem:[#allocation2]]  ;;  %v375_v24 = vmov 0   ;;  %s313_s23 = sld [smem:[#allocation2 + $0x1]]  ;;  %v376_v35 = vmov 839922192  }
  0x1f   : > { %s435_s10 = smov (!%p148_p0, %s302_s10), 1  ;;  %v173_v5 = vand.u32 127, %v172_v4  ;;  %v176_v6 = vshrl.u32 %v172_v4, 7  ;;  %341 = vset.pattern.permute.xlu1 %v375_v24  ;;  %342 = vset.pattern.permute.xlu0 %v375_v24  ;;  %v226_v36 = vunpack.c.l.s4 %v376_v35 }
  0x20   : > { %s318_s17 = sshll.u32 %s435_s10, 3 }
  0x21   : > { %s152_s20 = scalar_lea.vmem %s431_s1, %s318_s17  ;;  %v174_v7 = vadd.s32 4294967295, %v173_v5  ;;  %v195_v8 = vadd.s32 1, %v173_v5  ;;  %v208_v16 = vsub.s32 1, %v176_v6  ;;  %v187_v17 = vsub.s32 0, %v176_v6  ;;  %s157_s26 = scalar_lea.vmem %s432_s2, %s318_s17 }
  0x22   : > { %v158_v0 = vld [vmem:[%s152_s20] sm:$0xff]  ;;  %v227_v37 = vunpack.c.0.s8 %v226_v36 }
  0x23   : > { %v160_v1 = vrot.slane %v158_v0, 4  ;;  %v177_v9 = vsub.s32 %v174_v7, %v176_v6  ;;  %v198_v10 = vsub.s32 %v195_v8, %v176_v6  ;;  %v203_v14 = vstv %s314_s21 }
  0x24   : > { %v182_v15 = vstv %s170_s22  ;;  %v168_v25 = vstv %s313_s23  ;;  %v230_v38 = vsub.s32 %v227_v37, %v176_v6 }
  0x25   : > { %v162_v2 = vadd.f32 %v160_v1, %v158_v0 }
  0x27   : > { %v164_v3 = vsel %vm163_vm0, %v162_v2, 0.0 }
  0x28   : > { %165 = vadd.xlane.f32.xlu0 %v164_v3 }
  0xb5   : > { %v166_v11 = vpop.xlane.xlu0 %165 }
  0xb6   : > { %v178_v12 = vrot.slane %v166_v11, %v177_v9  ;;  %v199_v13 = vrot.slane %v166_v11, %v198_v10  ;;  %v169_v26 = vmul.f32 %v168_v25, %v166_v11 }
  0xb8   : > { %v202_v18 = vsel %vm201_vm1, %v199_v13, 0.0  ;;  %v181_v19 = vsel %vm180_vm2, 0.0, %v178_v12 }
  0xb9   : > { %v204_v20 = vmul.f32 %v203_v14, %v202_v18  ;;  %v183_v21 = vmul.f32 %v182_v15, %v181_v19 }
  0xbb   : > { %v209_v22 = vrot.slane %v204_v20, %v208_v16  ;;  %v188_v23 = vrot.slane %v183_v21, %v187_v17 }
  0xbd   : > { %211 = vbcast.lane.b32.xlu1 %v209_v22, 256  ;;  %190 = vbcast.lane.b32.xlu0 %v188_v23, 256 }
 0x12f   : > { %v191_v27 = vpop.permute.xlu0 %190  ;;  %v212_v29 = vpop.permute.xlu1 %211 }
 0x130   : > { %v193_v28 = vadd.f32 %v191_v27, %v169_v26 }
 0x132   : > { %v214_v30 = vadd.f32 %v212_v29, %v193_v28 }
 0x134   : > { %v315_v31 = vmul.f32 -1.442695, %v214_v30 }
 0x136   : > { %343 = vpow2.f32 %v315_v31 }
 0x140   : > { %v344_v32 = vpop.eup %343 }
 0x141   : > { %v218_v33 = vadd.f32 1.0, %v344_v32 }
 0x143   : > { %345 = vrcp.f32 %v218_v33 }
 0x14d   : > { %v346_v34 = vpop.eup %345 }
 0x14e   : > { %223 = vperm.xlu1 %341, %v346_v34  }
 0x1cd   : > { %v224_v39 = vpop.permute.xlu1 %223 }
 0x1ce   : > { %v231_v40 = vrot.slane %v224_v39, %v230_v38 }
 0x1d0   : > { %v233_v41 = vmul.f32 %v231_v40, %v158_v0 }
 0x1d2   : > { %234 = vst [vmem:[%s157_s26] sm:$0xff] %v233_v41 }
 0x1d3 PF: > { %s13_s9 = sadd.s32 1, %s372_s9  }
 0x1d4   : > { %p10_p1 = scmp.ge.s32.totalorder %s13_s9, 4  }
 0x1d6   :  { %12 = sbr.rel (!%p10_p1) target bundleno = 1 (0x1), region = 63 }
 0x1dd   :  { %256 = vsyncpa [#allocation3], 1 }
 0x1de   :  { %258 = vsyncpa [#allocation3 + $0x1], 1 }

</bundles_post_ra>
